<compile_context>
chip_gen: v5e
topology: v5e:2x2
jax: 0.10.0
libtpu: 0.0.40
codegen_flags: <defaults>
</compile_context>

<pallas_src>
import jax
import jax.numpy as jnp
from jax.experimental import pallas as pl
from jax.experimental.pallas import tpu as pltpu

BN_EPS = 1e-5
LANE = 128
NEG_BIG = -1e30   # finite large-negative for padded logit columns (never -inf -> NaN)


def _round_up(n, m):
    return (n + m - 1) // m * m


def ffn_kernel(x_ref, w1_ref, b1_ref, w2_ref, b2_ref, o_ref):
    """Fused: (Linear + folded BN) -> ReLU -> Linear -> log_softmax on one row tile."""
    # In-kernel cast (VPU) -- x streams as f32 from HBM, no wrapper astype round trip.
    x = x_ref[...].astype(w1_ref.dtype)                      # (TB, D_in)

    # layer1 + folded BatchNorm: x @ W1' + b1'   (MXU, f32 accumulate)
    h = jnp.dot(x, w1_ref[...], preferred_element_type=jnp.float32)
    h = h + b1_ref[...]                                       # (1, H_pad) broadcast, f32

    # ReLU (VPU).  Dropout(p=0.5) -> identity in eval mode.
    h = jnp.maximum(h, 0.0)

    # layer2: h @ W2 + b2  (MXU, f32 accumulate).  Padded hidden cols are exactly 0;
    # padded logit cols get b2 = -1e30 and vanish under log_softmax.
    logits = jnp.dot(h.astype(w2_ref.dtype), w2_ref[...],
                     preferred_element_type=jnp.float32)
    logits = logits + b2_ref[...]                             # (1, L_pad) broadcast, f32

    # numerically-stable log_softmax over the last dim (XLU/EUP epilogue).
    m = jnp.max(logits, axis=-1, keepdims=True)
    shifted = logits - m
    lse = jnp.log(jnp.sum(jnp.exp(shifted), axis=-1, keepdims=True))
    o_ref[...] = (shifted - lse).astype(o_ref.dtype)


def prepare_params(params, compute_dtype=jnp.float32):
    """Fold BatchNorm into layer1 (in f32), lane-pad H and L to multiples of 128,
    then cast MXU operands to compute_dtype (bf16 recommended on v5e/v6e/v7x)."""
    scale = params["gamma"] * jax.lax.rsqrt(params["running_var"] + BN_EPS)  # (1,H)
    w1 = params["w1"] * scale                                  # per-column scale (f32)
    b1 = (params["b1"] - params["running_mean"]) * scale + params["beta"]
    w2 = params["w2"]
    b2 = params["b2"]

    d_in, hidden = w1.shape
    n_out = w2.shape[1]
    h_pad = _round_up(hidden, LANE)
    l_pad = _round_up(n_out, LANE)

    if h_pad != hidden:
        # zero-padded hidden columns: h_pad = 0, ReLU(0)=0, w2 pad rows = 0 -> exact.
        w1 = jnp.pad(w1, ((0, 0), (0, h_pad - hidden)))
        b1 = jnp.pad(b1, ((0, 0), (0, h_pad - hidden)))
        w2 = jnp.pad(w2, ((0, h_pad - hidden), (0, 0)))
    if l_pad != n_out:
        # padded logit columns: weight 0, bias -1e30 -> exp(shifted) == 0 in lse.
        w2 = jnp.pad(w2, ((0, 0), (0, l_pad - n_out)))
        b2 = jnp.pad(b2, ((0, 0), (0, l_pad - n_out)), constant_values=NEG_BIG)

    return {
        "w1": w1.astype(compute_dtype),
        "b1": b1.astype(jnp.float32),
        "w2": w2.astype(compute_dtype),
        "b2": b2.astype(jnp.float32),
        "n_out": n_out,
    }


def feed_forward_network(x, prepared, *, block_b=1024):
    """x: (B, D_in) f32.  prepared: output of prepare_params()."""
    B, D_in = x.shape
    w1, b1, w2, b2 = prepared["w1"], prepared["b1"], prepared["w2"], prepared["b2"]
    n_out = prepared["n_out"]
    H_pad = w1.shape[1]
    L_pad = w2.shape[1]

    if B <= block_b:
        # Small/medium batch: one grid-less call, everything VMEM-resident.
        vmem = pl.BlockSpec(memory_space=pltpu.MemorySpace.VMEM)
        out = pl.pallas_call(
            ffn_kernel,
            out_shape=jax.ShapeDtypeStruct((B, L_pad), jnp.float32),
            in_specs=[vmem, vmem, vmem, vmem, vmem],
            out_specs=vmem,
        )(x, w1, b1, w2, b2)
        return out[:, :n_out]

    # Batched path: tile rows (no pad/slice of x); weights stay VMEM-resident.
    tb = block_b
    n_tiles = pl.cdiv(B, tb)
    # v7x megacore: with few tiles, an odd count gives a 2-vs-1 core split.
    # Re-derive tb so the tile count is even (harmless on v5e/v6e).
    if 1 < n_tiles < 8 and n_tiles % 2 == 1:
        n_tiles += 1
        tb = _round_up(pl.cdiv(B, n_tiles), 8)
        n_tiles = pl.cdiv(B, tb)

    out = pl.pallas_call(
        ffn_kernel,
        out_shape=jax.ShapeDtypeStruct((B, L_pad), jnp.float32),
        grid=(n_tiles,),
        in_specs=[
            pl.BlockSpec((tb, D_in), lambda i: (i, 0)),      # x: tile over rows
            pl.BlockSpec((D_in, H_pad), lambda i: (0, 0)),   # w1': resident
            pl.BlockSpec((1, H_pad), lambda i: (0, 0)),      # b1': resident
            pl.BlockSpec((H_pad, L_pad), lambda i: (0, 0)),  # w2: resident
            pl.BlockSpec((1, L_pad), lambda i: (0, 0)),      # b2: resident
        ],
        out_specs=pl.BlockSpec((tb, L_pad), lambda i: (i, 0)),
        compiler_params=pltpu.CompilerParams(
            dimension_semantics=("parallel",)),              # 2 TCs on v7x
    )(x, w1, b1, w2, b2)
    # Drop padded logit columns (tiny copy; keeps lane-dense stores in the kernel).
    return out[:, :n_out]


def init_params(key, d_in, hidden, n_lang):
    """Deterministic synthetic parameters (PyTorch-Linear-like fan-in scaling)."""
    k1, k2, k3, k4, k5 = jax.random.split(key, 5)
    s1 = 1.0 / jnp.sqrt(d_in)
    s2 = 1.0 / jnp.sqrt(hidden)
    return {
        # stored pre-transposed: (in, out)
        "w1": jax.random.uniform(k1, (d_in, hidden), jnp.float32, -s1, s1),
        "b1": jax.random.uniform(k2, (1, hidden), jnp.float32, -s1, s1),
        "gamma": jnp.ones((1, hidden), jnp.float32),
        "beta": jnp.zeros((1, hidden), jnp.float32),
        "running_mean": 0.1 * jax.random.normal(k3, (1, hidden), jnp.float32),
        "running_var": jnp.ones((1, hidden), jnp.float32)
                       + 0.05 * jax.random.uniform(k4, (1, hidden), jnp.float32),
        "w2": jax.random.uniform(k5, (hidden, n_lang), jnp.float32, -s2, s2),
        "b2": jnp.zeros((1, n_lang), jnp.float32),
    }


def reference(x, p):
    """Pure-JAX reference of the original (unfolded, unpadded) forward pass."""
    h = x @ p["w1"] + p["b1"]
    h = (h - p["running_mean"]) * jax.lax.rsqrt(p["running_var"] + BN_EPS) \
        * p["gamma"] + p["beta"]
    h = jnp.maximum(h, 0.0)
    logits = h @ p["w2"] + p["b2"]
    return jax.nn.log_softmax(logits, axis=-1)


if __name__ == "__main__":
    # small shapes: len(alphabets)=16, max_length=8 -> D_in=128; hidden=64; 16 languages
    B, ALPHA, MAXLEN, HIDDEN, N_LANG = 8, 16, 8, 64, 16
    D_IN = ALPHA * MAXLEN

    key = jax.random.PRNGKey(0)
    kx, kp, kx2 = jax.random.split(key, 3)
    x = jax.random.normal(kx, (B, D_IN), jnp.float32)
    params = init_params(kp, D_IN, HIDDEN, N_LANG)

    # --- path 1: tiny batch, f32, grid-less VMEM-resident call --------------
    prepared_f32 = prepare_params(params, compute_dtype=jnp.float32)
    out = jax.block_until_ready(feed_forward_network(x, prepared_f32))
    ref = reference(x, params)
    assert out.shape == (B, N_LANG)
    assert jnp.allclose(out, ref, atol=3e-5, rtol=1e-5), "f32 small-batch mismatch"
    assert jnp.allclose(jnp.sum(jnp.exp(out), axis=-1), 1.0, atol=1e-5)

    # --- path 2: batched grid (non-multiple of tile, partial last block), f32 ---
    B2 = 600
    x2 = jax.random.normal(kx2, (B2, D_IN), jnp.float32)
    ref2 = reference(x2, params)
    out2 = jax.block_until_ready(feed_forward_network(x2, prepared_f32, block_b=256))
    assert out2.shape == (B2, N_LANG)
    assert jnp.allclose(out2, ref2, atol=3e-5, rtol=1e-5), "f32 batched mismatch"

    # --- path 3: same batch through the default block_b (grid-less), f32 --------
    out2b = jax.block_until_ready(feed_forward_network(x2, prepared_f32))
    assert jnp.allclose(out2b, ref2, atol=3e-5, rtol=1e-5), "f32 default-block mismatch"

    # --- path 4: batched grid, bf16 MXU operands (all generations), f32 accum ---
    prepared_bf16 = prepare_params(params, compute_dtype=jnp.bfloat16)
    out3 = jax.block_until_ready(feed_forward_network(x2, prepared_bf16, block_b=256))
    assert out3.shape == (B2, N_LANG)
    assert jnp.allclose(out3, ref2, atol=1e-1, rtol=5e-2), "bf16 batched mismatch"
    assert jnp.allclose(jnp.sum(jnp.exp(out3), axis=-1), 1.0, atol=1e-2)

    print("KERNEL_OK")
</pallas_src>

<mosaic_0001>
module attributes {stable_mosaic.version = 11 : i64} {
  func.func @ffn_kernel(%arg0: memref<8x128xf32, #tpu.memory_space<vmem>>, %arg1: memref<128x128xf32, #tpu.memory_space<vmem>>, %arg2: memref<1x128xf32, #tpu.memory_space<vmem>>, %arg3: memref<128x128xf32, #tpu.memory_space<vmem>>, %arg4: memref<1x128xf32, #tpu.memory_space<vmem>>, %arg5: memref<8x128xf32, #tpu.memory_space<vmem>>) attributes {dimension_semantics = [], scalar_prefetch = 0 : i64, scratch_operands = 0 : i64, tpu.core_type = #tpu.core_type<tc>} {
    %c0 = arith.constant 0 : index
    %c0_0 = arith.constant 0 : index
    %0 = vector.load %arg0[%c0, %c0_0] : memref<8x128xf32, #tpu.memory_space<vmem>>, vector<8x128xf32>
    %c0_1 = arith.constant 0 : index
    %c0_2 = arith.constant 0 : index
    %1 = vector.load %arg1[%c0_1, %c0_2] : memref<128x128xf32, #tpu.memory_space<vmem>>, vector<128x128xf32>
    %cst = arith.constant dense<0.000000e+00> : vector<8x128xf32>
    %2 = tpu.matmul %0, %1, %cst {dimension_numbers = #tpu.dot_dimension_numbers<[1], [0], [0], [1], [0, 0, 1, 1], [], []>} : vector<8x128xf32>, vector<128x128xf32>, vector<8x128xf32> -> vector<8x128xf32>
    %c0_3 = arith.constant 0 : index
    %c0_4 = arith.constant 0 : index
    %3 = vector.load %arg2[%c0_3, %c0_4] : memref<1x128xf32, #tpu.memory_space<vmem>>, vector<1x128xf32>
    %4 = vector.broadcast %3 : vector<1x128xf32> to vector<8x128xf32>
    %5 = arith.addf %2, %4 : vector<8x128xf32>
    %cst_5 = arith.constant 0.000000e+00 : f32
    %6 = vector.broadcast %cst_5 : f32 to vector<8x128xf32>
    %7 = arith.maximumf %5, %6 : vector<8x128xf32>
    %c0_6 = arith.constant 0 : index
    %c0_7 = arith.constant 0 : index
    %8 = vector.load %arg3[%c0_6, %c0_7] : memref<128x128xf32, #tpu.memory_space<vmem>>, vector<128x128xf32>
    %cst_8 = arith.constant dense<0.000000e+00> : vector<8x128xf32>
    %9 = tpu.matmul %7, %8, %cst_8 {dimension_numbers = #tpu.dot_dimension_numbers<[1], [0], [0], [1], [0, 0, 1, 1], [], []>} : vector<8x128xf32>, vector<128x128xf32>, vector<8x128xf32> -> vector<8x128xf32>
    %c0_9 = arith.constant 0 : index
    %c0_10 = arith.constant 0 : index
    %10 = vector.load %arg4[%c0_9, %c0_10] : memref<1x128xf32, #tpu.memory_space<vmem>>, vector<1x128xf32>
    %11 = vector.broadcast %10 : vector<1x128xf32> to vector<8x128xf32>
    %12 = arith.addf %9, %11 : vector<8x128xf32>
    %cst_11 = arith.constant dense<0xFF800000> : vector<8xf32>
    %13 = vector.multi_reduction <maximumf>, %12, %cst_11 [1] : vector<8x128xf32> to vector<8xf32>
    %14 = vector.shape_cast %13 : vector<8xf32> to vector<8x1xf32>
    %15 = vector.broadcast %14 : vector<8x1xf32> to vector<8x128xf32>
    %16 = arith.subf %12, %15 : vector<8x128xf32>
    %17 = math.exp %16 : vector<8x128xf32>
    %cst_12 = arith.constant dense<0.000000e+00> : vector<8xf32>
    %18 = vector.multi_reduction <add>, %17, %cst_12 [1] : vector<8x128xf32> to vector<8xf32>
    %19 = vector.shape_cast %18 : vector<8xf32> to vector<8x1xf32>
    %20 = math.log %19 : vector<8x1xf32>
    %21 = vector.broadcast %20 : vector<8x1xf32> to vector<8x128xf32>
    %22 = arith.subf %16, %21 : vector<8x128xf32>
    %c0_13 = arith.constant 0 : index
    %c0_14 = arith.constant 0 : index
    %23 = vector.load %arg5[%c0_13, %c0_14] : memref<8x128xf32, #tpu.memory_space<vmem>>, vector<8x128xf32>
    tpu.vector_store %arg5[%c0_13, %c0_14], %22 {strides = array<i32>} : memref<8x128xf32, #tpu.memory_space<vmem>>, vector<8x128xf32>,
    return
  }
}

</mosaic_0001>

<bundles_post_ra>
// kernel: tpu_custom_call.1
= control target key start
LH: loop header
LB: loop body
LE: loop exit
PB: predicated region body
PF: predicated region fallthrough
CT: control target
= control target key end

     0   :  { %10 = vsyncpa [#allocation3], 0  ;;  %s345_s0 = inlined_call_operand.hbm [shape: f32[8,128], index: 0, kind: input, shape index: {}]   ;;  %s346_s1 = inlined_call_operand.hbm [shape: f32[128,128], index: 1, kind: input, shape index: {}]   ;;  %s347_s2 = inlined_call_operand.vmem [shape: f32[1,128], index: 2, kind: input, shape index: {}]   ;;  %s348_s3 = inlined_call_operand.hbm [shape: f32[128,128], index: 3, kind: input, shape index: {}]   ;;  %s349_s4 = inlined_call_operand.vmem [shape: f32[1,128], index: 4, kind: input, shape index: {}]   ;;  %s350_s5 = inlined_call_operand.hbm [shape: f32[8,128], index: 5, kind: output, shape index: {}]  }
   0x1   :  { %11 = vsyncpa [#allocation6], 0  ;;  %s28_s20 = sshll.u32 %s346_s1, 4  ;;  %s29_s20 = int_to_ptr.hbm [resolvable:$true] %s28_s20 }
   0x2   :  { %12 = vsyncpa [#allocation4], 0  ;;  %s291_s21 = smov [#allocation5]   ;;  %s18_s25 = sshll.u32 %s345_s0, 4  ;;  %s19_s25 = int_to_ptr.hbm [resolvable:$true] %s18_s25 }
   0x3   :  { %s30_s22 = sshll.u32 %s291_s21, 4  ;;  %s292_s26 = smov 128   ;;  %s31_s22 = int_to_ptr.vmem [resolvable:$true] %s30_s22 }
   0x4   :  { %s293_s27 = smov 8   ;;  %s294_s28 = smov [#allocation2]  }
   0x5   :  { %36 = dma.hbm_to_vmem [thread:$0]  %s29_s20, 2048, %s31_s22, [#allocation6], %s292_s26, %s292_s26, %s293_s27  }
   0x6   :  { %s20_s29 = sshll.u32 %s294_s28, 4  ;;  %s43_s7 = sshll.u32 %s348_s3, 4  ;;  %s21_s29 = int_to_ptr.vmem [resolvable:$true] %s20_s29  ;;  %s44_s7 = int_to_ptr.hbm [resolvable:$true] %s43_s7 }
   0x7   :  { %23 = dma.hbm_to_vmem [thread:$0]  %s19_s25, 128, %s21_s29, [#allocation3]  }
   0x8   :  { %s295_s1 = smov [#allocation7]  }
   0x9   :  { %s45_s8 = sshll.u32 %s295_s1, 4  ;;  %s46_s8 = int_to_ptr.vmem [resolvable:$true] %s45_s8 }
   0xa   :  { %51 = dma.hbm_to_vmem [thread:$0]  %s44_s7, 2048, %s46_s8, [#allocation6], %s292_s26, %s292_s26, %s293_s27  }
   0xb   :  { %285 = dma.done.wait [#allocation3], 128  }
   0xc   :  { %286 = vsyncadd [#allocation3], 4294967168 }
   0xd   :  { %287 = dma.done.wait [#allocation6], 4096  }
   0xe   :  { %288 = vsyncadd [#allocation6], 4294963200  ;;  %v82_v0 = vld [vmem:[#allocation5 + $0x78] sm:$0xff]  ;;  %v81_v1 = vld [vmem:[#allocation5 + $0x70] sm:$0xff]  ;;  %s166_s14 = sshll.u32 %s350_s5, 4  ;;  %s167_s14 = int_to_ptr.hbm [resolvable:$true] %s166_s14 }
   0xf   :  { %87 = vmatpush.msra.mxu0 %v82_v0  ;;  %v80_v2 = vld [vmem:[#allocation5 + $0x68] sm:$0xff]  ;;  %v79_v3 = vld [vmem:[#allocation5 + $0x60] sm:$0xff]  ;;  %v123_v4 = vld [vmem:[#allocation7 + $0x78] sm:$0xff] }
  0x10   :  { %v78_v5 = vld [vmem:[#allocation5 + $0x58] sm:$0xff]  ;;  %128 = vmatpush.msra.mxu1 %v123_v4  ;;  %v122_v6 = vld [vmem:[#allocation7 + $0x70] sm:$0xff]  ;;  %v121_v7 = vld [vmem:[#allocation7 + $0x68] sm:$0xff] }
  0x11   :  { %88 = vmatpush.msra.mxu0 %v81_v1  ;;  %v77_v8 = vld [vmem:[#allocation5 + $0x50] sm:$0xff]  ;;  %v120_v9 = vld [vmem:[#allocation7 + $0x60] sm:$0xff]  ;;  %v76_v10 = vld [vmem:[#allocation5 + $0x48] sm:$0xff] }
  0x12   :  { %129 = vmatpush.msra.mxu1 %v122_v6  ;;  %v119_v11 = vld [vmem:[#allocation7 + $0x58] sm:$0xff]  ;;  %v75_v12 = vld [vmem:[#allocation5 + $0x40] sm:$0xff]  ;;  %v118_v13 = vld [vmem:[#allocation7 + $0x50] sm:$0xff] }
  0x13   :  { %89 = vmatpush.msra.mxu0 %v80_v2  ;;  %v74_v14 = vld [vmem:[#allocation5 + $0x38] sm:$0xff]  ;;  %v117_v15 = vld [vmem:[#allocation7 + $0x48] sm:$0xff]  ;;  %v73_v16 = vld [vmem:[#allocation5 + $0x30] sm:$0xff] }
  0x14   :  { %130 = vmatpush.msra.mxu1 %v121_v7  ;;  %v116_v17 = vld [vmem:[#allocation7 + $0x40] sm:$0xff]  ;;  %v72_v18 = vld [vmem:[#allocation5 + $0x28] sm:$0xff]  ;;  %v115_v19 = vld [vmem:[#allocation7 + $0x38] sm:$0xff] }
  0x15   :  { %90 = vmatpush.msra.mxu0 %v79_v3  ;;  %v71_v20 = vld [vmem:[#allocation5 + $0x20] sm:$0xff]  ;;  %v114_v21 = vld [vmem:[#allocation7 + $0x30] sm:$0xff]  ;;  %v70_v22 = vld [vmem:[#allocation5 + $0x18] sm:$0xff] }
  0x16   :  { %131 = vmatpush.msra.mxu1 %v120_v9  ;;  %v113_v23 = vld [vmem:[#allocation7 + $0x28] sm:$0xff]  ;;  %v69_v24 = vld [vmem:[#allocation5 + $0x10] sm:$0xff]  ;;  %v112_v25 = vld [vmem:[#allocation7 + $0x20] sm:$0xff] }
  0x17   :  { %91 = vmatpush.msra.mxu0 %v78_v5  ;;  %v68_v26 = vld [vmem:[#allocation5 + $0x8] sm:$0xff]  ;;  %v111_v27 = vld [vmem:[#allocation7 + $0x18] sm:$0xff]  ;;  %v67_v28 = vld [vmem:[#allocation5] sm:$0xff] }
  0x18   :  { %132 = vmatpush.msra.mxu1 %v119_v11  ;;  %v66_v29 = vld [vmem:[#allocation2] sm:$0xff]  ;;  %v110_v30 = vld [vmem:[#allocation7 + $0x10] sm:$0xff]  ;;  %v109_v31 = vld [vmem:[#allocation7 + $0x8] sm:$0xff] }
  0x19   :  { %92 = vmatpush.msra.mxu0 %v77_v8  ;;  %v108_v32 = vld [vmem:[#allocation7] sm:$0xff]  ;;  %v183_v33 = vld [vmem:[%s347_s2] ss:$0 sm:$0xff]  ;;  %s296_s2 = smov [#allocation8]  }
  0x1a   :  { %133 = vmatpush.msra.mxu1 %v118_v13  ;;  %v184_v37 = vld [vmem:[%s349_s4] ss:$0 sm:$0xff]  ;;  %s164_s11 = sshll.u32 %s296_s2, 4  ;;  %s165_s11 = int_to_ptr.vmem [resolvable:$true] %s164_s11 }
  0x1b   :  { %93 = vmatpush.msra.mxu0 %v76_v10 }
  0x1c   :  { %134 = vmatpush.msra.mxu1 %v117_v15 }
  0x1d   :  { %94 = vmatpush.msra.mxu0 %v75_v12 }
  0x1e   :  { %135 = vmatpush.msra.mxu1 %v116_v17 }
  0x1f   :  { %95 = vmatpush.msra.mxu0 %v74_v14 }
  0x20   :  { %136 = vmatpush.msra.mxu1 %v115_v19 }
  0x21   :  { %96 = vmatpush.msra.mxu0 %v73_v16 }
  0x22   :  { %137 = vmatpush.msra.mxu1 %v114_v21 }
  0x23   :  { %97 = vmatpush.msra.mxu0 %v72_v18 }
  0x24   :  { %138 = vmatpush.msra.mxu1 %v113_v23 }
  0x25   :  { %98 = vmatpush.msra.mxu0 %v71_v20 }
  0x26   :  { %139 = vmatpush.msra.mxu1 %v112_v25 }
  0x27   :  { %99 = vmatpush.msra.mxu0 %v70_v22 }
  0x28   :  { %140 = vmatpush.msra.mxu1 %v111_v27 }
  0x29   :  { %100 = vmatpush.msra.mxu0 %v69_v24 }
  0x2a   :  { %141 = vmatpush.msra.mxu1 %v110_v30 }
  0x2b   :  { %101 = vmatpush.msra.mxu0 %v68_v26 }
  0x2c   :  { %142 = vmatpush.msra.mxu1 %v109_v31 }
  0x2d   :  { %102 = vmatpush.msra.mxu0 %v67_v28 }
  0x2e   :  { %103 = vmatmul.f32.vlgmr.msra.gmra.mxu0 %v66_v29  ;;  %143 = vmatpush.msra.mxu1 %v108_v32 }
  0xab   :  { %v104_v34 = vpop.f32.mrf.mxu0 }
  0xac   :  { %v105_v35 = vadd.f32 %v183_v33, %v104_v34 }
  0xae   :  { %v107_v36 = vmax.f32 %v105_v35, 0.0 }
  0xb0   :  { %144 = vmatmul.f32.vlgmr.msra.gmra.mxu1 %v107_v36 }
 0x12d   :  { %v145_v38 = vpop.f32.mrf.mxu1 }
 0x12e   :  { %v146_v39 = vadd.f32 %v184_v37, %v145_v38 }
 0x130   :  { %148 = vmax.xlane.f32.xlu0 %v146_v39 }
 0x1a3   :  { %v149_v40 = vpop.xlane.xlu0 %148 }
 0x1a4   :  { %v150_v41 = vsub.f32 %v146_v39, %v149_v40 }
 0x1a6   :  { %v151_v42 = vmul.f32 1.442695, %v150_v41 }
 0x1a8   :  { %185 = vpow2.f32 %v151_v42 }
 0x1ae   :  { %v186_v43 = vpop.eup %185 }
 0x1af   :  { %153 = vadd.xlane.f32.xlu0 %v186_v43 }
 0x222   :  { %v154_v44 = vpop.xlane.xlu0 %153 }
 0x223   :  { %187 = vlog2.f32 %v154_v44 }
 0x229   :  { %v188_v45 = vpop.eup %187 }
 0x22a   :  { %v156_v46 = vmul.f32 0.6931472, %v188_v45 }
 0x22c   :  { %v157_v47 = vsub.f32 %v150_v41, %v156_v46 }
 0x22e   :  { %158 = vst [vmem:[#allocation8] sm:$0xff] %v157_v47 }
 0x22f   :  { %169 = dma.vmem_to_hbm [thread:$0]  %s165_s11, 128, %s167_s14, [#allocation4]  }
 0x230   :  { %289 = dma.done.wait [#allocation4], 128  }
 0x231   :  { %290 = vsyncadd [#allocation4], 4294967168 }
 0x232   :  { %174 = vsyncpa [#allocation3], 1 }
 0x233   :  { %175 = vsyncpa [#allocation6], 1 }
 0x234   :  { %176 = vsyncpa [#allocation4], 1 }

</bundles_post_ra>
